<compile_context>
chip_gen: v5e
topology: v5e:2x2
jax: 0.10.0
libtpu: 0.0.40
codegen_flags: <defaults>
</compile_context>

<pallas_src>
import jax
import jax.numpy as jnp
from jax.experimental import pallas as pl
from jax.experimental.pallas import tpu as pltpu


def _round_up(n, m):
    return ((n + m - 1) // m) * m


def _nsp_kernel(x_ref, w_ref, b_ref, o_ref):
    # x_ref: (TM, D) f32/bf16, w_ref: (D, 1) same dtype as x,
    # b_ref: (1, 1) f32, o_ref: (TM, 2) same dtype as x.
    #
    # 2-class softmax == sigmoid of the logit difference:
    #   diff = x @ (w1 - w0) + (b1 - b0)
    #   p1   = 1 / (1 + exp(-diff)),  p0 = 1 - p1
    # One MXU matvec (f32 accumulate) + one EUP exp; numerically stable for
    # any logit magnitude (exp overflow -> inf -> p1 == 0, no NaN).
    diff = jnp.dot(x_ref[...], w_ref[...], preferred_element_type=jnp.float32)
    diff = diff + b_ref[...]                       # (TM, 1) f32
    p1 = 1.0 / (1.0 + jnp.exp(-diff))
    p0 = 1.0 - p1
    lane = jax.lax.broadcasted_iota(jnp.int32, o_ref.shape, 1)
    o_ref[...] = jnp.where(lane == 1, p1, p0).astype(o_ref.dtype)


def _tpu_params():
    """Return (vmem_capacity_bytes, tensorcores_per_chip), conservative fallback."""
    vmem = 64 * 1024 * 1024          # per-TC VMEM on the smallest modern part (v7x)
    cores = 2                        # assume megacore; splitting is cheap if wrong
    try:
        info = pltpu.get_tpu_info()
        vmem = int(getattr(info, "vmem_capacity_bytes", vmem))
    except Exception:
        pass
    try:
        kind = jax.devices()[0].device_kind.lower()
        # Single-TensorCore parts: skip the megacore tile split.
        if any(t in kind for t in ("v5e", "v5 lite", "v5lite",
                                   "v6e", "v6 lite", "v6lite")):
            cores = 1
        # v7x: 64 MiB per TC regardless of what the chip-level query reports.
        if "v7" in kind:
            vmem = min(vmem, 64 * 1024 * 1024)
    except Exception:
        pass
    return vmem, cores


def _select_tile(B, D, x_itemsize, out_itemsize, vmem_bytes, cores):
    """Pick (tm, grid_steps) for the streamed x row-tile."""
    # x double-buffer budget ~ 3/8 of VMEM.  Per-row cost includes the
    # lane-padded (last-dim-2 -> 128 lanes) output tile so small-D configs
    # can't overrun VMEM once the old 1024-row cap is gone.
    x_budget = int(vmem_bytes) * 3 // 8
    per_row = D * x_itemsize + 128 * out_itemsize
    tm = max(8, (x_budget // (2 * per_row)) // 8 * 8)
    if cores > 1:
        # Megacore: shard the grid axis across TensorCores; for large batches
        # keep >= 2 steps per core so each core's DMA stays double-buffered.
        if B >= 32 * cores:
            tm = min(tm, _round_up(pl.cdiv(B, 2 * cores), 8))
        elif B >= 8 * cores:
            tm = min(tm, _round_up(pl.cdiv(B, cores), 8))
    tm = min(tm, _round_up(B, 8))
    # Rebalance so padding stays < 8 rows per grid step (never pad ~a whole tile).
    grid_steps = pl.cdiv(_round_up(B, 8), tm)
    tm = _round_up(pl.cdiv(B, grid_steps), 8)
    return tm, grid_steps


def nsp_forward_pallas(x, w, b, *, tm=None):
    """softmax(x @ w + b, axis=-1) for a 2-class NSP head, as a Pallas kernel.

    x: [B, D] (f32 or bf16), w: [D, 2], b: [2].  Any B >= 1 (padded internally).
    bf16 x halves the bytes of the dominant HBM stream; accumulation and the
    sigmoid epilogue are always f32.
    """
    B, D = x.shape
    vmem_bytes, cores = _tpu_params()

    # Fold the 2-class head into a single logit-difference column.
    w_diff = (w[:, 1] - w[:, 0]).astype(x.dtype).reshape(D, 1)
    b_diff = (b[1] - b[0]).astype(jnp.float32).reshape(1, 1)

    x_itemsize = jnp.dtype(x.dtype).itemsize
    out_itemsize = x_itemsize
    if tm is None:
        tm, grid_steps = _select_tile(B, D, x_itemsize, out_itemsize,
                                      vmem_bytes, cores)
    else:
        tm = max(8, (tm // 8) * 8)
        tm = min(tm, _round_up(B, 8))
        grid_steps = pl.cdiv(_round_up(B, 8), tm)

    Bp = grid_steps * tm
    if Bp != B:
        x = jnp.pad(x, ((0, Bp - B), (0, 0)))

    cost = pl.CostEstimate(
        flops=2 * Bp * D,
        transcendentals=Bp,
        bytes_accessed=x_itemsize * Bp * D + out_itemsize * Bp * 2
        + x_itemsize * D + 4,
    )

    out = pl.pallas_call(
        _nsp_kernel,
        out_shape=jax.ShapeDtypeStruct((Bp, 2), x.dtype),
        grid_spec=pltpu.PrefetchScalarGridSpec(
            num_scalar_prefetch=0,
            grid=(grid_steps,),
            in_specs=[
                pl.BlockSpec((tm, D), lambda i: (i, 0)),   # x tile (streamed)
                pl.BlockSpec((D, 1), lambda i: (0, 0)),    # folded weight (resident)
                pl.BlockSpec((1, 1), lambda i: (0, 0)),    # folded bias (resident)
            ],
            out_specs=pl.BlockSpec((tm, 2), lambda i: (i, 0)),
        ),
        compiler_params=pltpu.CompilerParams(
            dimension_semantics=("parallel",),
            vmem_limit_bytes=int(vmem_bytes) * 3 // 4,
        ),
        cost_estimate=cost,
    )(x, w_diff, b_diff)
    return out[:B]


def nsp_forward(x, w, b, *, min_pallas_batch=1024, tm=None):
    """NSP head forward. Tiny batches go to plain XLA (launch overhead wins)."""
    if x.shape[0] < min_pallas_batch:
        logits = jnp.dot(x, w, preferred_element_type=jnp.float32) + b
        return jax.nn.softmax(logits, axis=-1).astype(x.dtype)
    return nsp_forward_pallas(x, w, b, tm=tm)


if __name__ == "__main__":
    # small, deterministic synthetic shapes: batch=8, d_model=32
    B, D = 8, 32
    key = jax.random.PRNGKey(0)
    kx, kw, kb = jax.random.split(key, 3)

    x = jax.random.normal(kx, (B, D), dtype=jnp.float32)
    # deterministic "linear" parameters (stand-in for nn.Linear(d_model, 2))
    w = jax.random.normal(kw, (D, 2), dtype=jnp.float32) * 0.02
    b = jax.random.normal(kb, (2,), dtype=jnp.float32) * 0.02

    ref = jax.nn.softmax(x @ w + b, axis=-1)

    # Force the Pallas path so the kernel itself is exercised (f32).
    out = jax.block_until_ready(nsp_forward_pallas(x, w, b))
    assert out.shape == (B, 2)
    assert jnp.allclose(out, ref, atol=1e-5, rtol=1e-5)
    assert jnp.allclose(jnp.sum(out, axis=-1), 1.0, atol=1e-5)

    # bf16 activation path: bf16 matmul on the MXU, f32 epilogue.
    out_bf16 = jax.block_until_ready(
        nsp_forward_pallas(x.astype(jnp.bfloat16), w, b))
    assert out_bf16.shape == (B, 2) and out_bf16.dtype == jnp.bfloat16
    assert jnp.allclose(out_bf16.astype(jnp.float32), ref, atol=2e-2)

    # Ragged batch (padding / rebalancing) path.
    B2 = 20
    x2 = jax.random.normal(kx, (B2, D), dtype=jnp.float32)
    ref2 = jax.nn.softmax(x2 @ w + b, axis=-1)
    out2 = jax.block_until_ready(nsp_forward_pallas(x2, w, b))
    assert out2.shape == (B2, 2)
    assert jnp.allclose(out2, ref2, atol=1e-5, rtol=1e-5)

    # Dispatcher path (small B -> plain XLA) must agree too.
    out3 = jax.block_until_ready(nsp_forward(x, w, b))
    assert jnp.allclose(out3, ref, atol=1e-5, rtol=1e-5)

    print("KERNEL_OK")
</pallas_src>

<mosaic_0001>
module attributes {stable_mosaic.version = 11 : i64} {
  func.func @_nsp_kernel(%arg0: i32, %arg1: memref<8x32xf32, #tpu.memory_space<vmem>>, %arg2: memref<32x1xf32, #tpu.memory_space<vmem>>, %arg3: memref<1x1xf32, #tpu.memory_space<vmem>>, %arg4: memref<8x2xf32, #tpu.memory_space<vmem>>) attributes {dimension_semantics = [#tpu.dimension_semantics<parallel>], iteration_bounds = array<i64: 1>, scalar_prefetch = 0 : i64, scratch_operands = 0 : i64, tpu.core_type = #tpu.core_type<tc>, window_params = [{transform_indices = @transform_0, window_bounds = array<i64: 8, 32>}, {pipeline_mode = #tpu.pipeline_mode<synchronous>, transform_indices = @transform_1, window_bounds = array<i64: 32, 1>}, {pipeline_mode = #tpu.pipeline_mode<synchronous>, transform_indices = @transform_2, window_bounds = array<i64: 1, 1>}, {transform_indices = @transform_3, window_bounds = array<i64: 8, 2>}]} {
    %c0 = arith.constant 0 : index
    %c0_0 = arith.constant 0 : index
    %0 = vector.load %arg1[%c0, %c0_0] : memref<8x32xf32, #tpu.memory_space<vmem>>, vector<8x32xf32>
    %c0_1 = arith.constant 0 : index
    %c0_2 = arith.constant 0 : index
    %1 = vector.load %arg2[%c0_1, %c0_2] : memref<32x1xf32, #tpu.memory_space<vmem>>, vector<32x1xf32>
    %cst = arith.constant dense<0.000000e+00> : vector<8x1xf32>
    %2 = tpu.matmul %0, %1, %cst {dimension_numbers = #tpu.dot_dimension_numbers<[1], [0], [0], [1], [0, 0, 1, 1], [], []>} : vector<8x32xf32>, vector<32x1xf32>, vector<8x1xf32> -> vector<8x1xf32>
    %c0_3 = arith.constant 0 : index
    %c0_4 = arith.constant 0 : index
    %3 = vector.load %arg3[%c0_3, %c0_4] : memref<1x1xf32, #tpu.memory_space<vmem>>, vector<1x1xf32>
    %4 = vector.broadcast %3 : vector<1x1xf32> to vector<8x1xf32>
    %5 = arith.addf %2, %4 : vector<8x1xf32>
    %cst_5 = arith.constant 0.000000e+00 : f32
    %6 = vector.broadcast %cst_5 : f32 to vector<8x1xf32>
    %7 = arith.subf %6, %5 : vector<8x1xf32>
    %8 = math.exp %7 : vector<8x1xf32>
    %cst_6 = arith.constant 1.000000e+00 : f32
    %9 = vector.broadcast %cst_6 : f32 to vector<8x1xf32>
    %10 = arith.addf %9, %8 : vector<8x1xf32>
    %cst_7 = arith.constant 1.000000e+00 : f32
    %11 = vector.broadcast %cst_7 : f32 to vector<8x1xf32>
    %12 = arith.divf %11, %10 : vector<8x1xf32>
    %cst_8 = arith.constant 1.000000e+00 : f32
    %13 = vector.broadcast %cst_8 : f32 to vector<8x1xf32>
    %14 = arith.subf %13, %12 : vector<8x1xf32>
    %15 = tpu.iota {dimensions = array<i32: 1>} : vector<8x2xi32>
    %c1_i32 = arith.constant 1 : i32
    %16 = vector.broadcast %c1_i32 : i32 to vector<8x2xi32>
    %17 = arith.cmpi eq, %15, %16 : vector<8x2xi32>
    %18 = vector.shape_cast %12 : vector<8x1xf32> to vector<8x1xf32>
    %19 = vector.broadcast %18 : vector<8x1xf32> to vector<8x2xf32>
    %20 = vector.shape_cast %14 : vector<8x1xf32> to vector<8x1xf32>
    %21 = vector.broadcast %20 : vector<8x1xf32> to vector<8x2xf32>
    %22 = arith.select %17, %19, %21 : vector<8x2xi1>, vector<8x2xf32>
    %c0_9 = arith.constant 0 : index
    %c0_10 = arith.constant 0 : index
    %23 = vector.load %arg4[%c0_9, %c0_10] : memref<8x2xf32, #tpu.memory_space<vmem>>, vector<8x2xf32>
    tpu.vector_store %arg4[%c0_9, %c0_10], %22 {strides = array<i32>} : memref<8x2xf32, #tpu.memory_space<vmem>>, vector<8x2xf32>,
    return
  }
  func.func @transform_0(%arg0: i32) -> (i32, i32) {
    %c0_i32 = arith.constant 0 : i32
    %c0_i32_0 = arith.constant 0 : i32
    return %arg0, %c0_i32 : i32, i32
  }
  func.func @transform_1(%arg0: i32) -> (i32, i32) {
    %c0_i32 = arith.constant 0 : i32
    %c0_i32_0 = arith.constant 0 : i32
    %c0_i32_1 = arith.constant 0 : i32
    return %c0_i32, %c0_i32_0 : i32, i32
  }
  func.func @transform_2(%arg0: i32) -> (i32, i32) {
    %c0_i32 = arith.constant 0 : i32
    %c0_i32_0 = arith.constant 0 : i32
    %c0_i32_1 = arith.constant 0 : i32
    return %c0_i32, %c0_i32_0 : i32, i32
  }
  func.func @transform_3(%arg0: i32) -> (i32, i32) {
    %c0_i32 = arith.constant 0 : i32
    %c0_i32_0 = arith.constant 0 : i32
    return %arg0, %c0_i32 : i32, i32
  }
}

</mosaic_0001>

<bundles_post_ra>
// kernel: tpu_custom_call.1
= control target key start
LH: loop header
LB: loop body
LE: loop exit
PB: predicated region body
PF: predicated region fallthrough
CT: control target
= control target key end

     0   :  { %vm25_vm0 = vcmask 261120   ;;  %v97_v6 = vmov 0   ;;  %v69_v25 = vlaneseq  ;;  %vm83_vm6 = vcmask 15360   ;;  %s139_s1 = inlined_call_operand.vmem [shape: f32[32,1], index: 1, kind: input, shape index: {}]   ;;  %s140_s2 = inlined_call_operand.<no memory space> [shape: f32[1,1], index: 2, kind: input, shape index: {}]   ;;  %s141_s0 = inlined_call_operand.vmem [shape: f32[8,32], index: 0, kind: input, shape index: {}]   ;;  %s142_s3 = inlined_call_operand.vmem [shape: f32[8,2], index: 3, kind: output, shape index: {}]  }
   0x1   :  { %v20_v0 = vld [vmem:[%s139_s1 + $0x18] sm:$0xff]  ;;  %v19_v1 = vld [vmem:[%s139_s1 + $0x10] sm:$0xff]  ;;  %v8_v2 = vstv %s140_s2  ;;  %v18_v3 = vld [vmem:[%s139_s1 + $0x8] sm:$0xff]  ;;  %91 = vset.pattern.permute.xlu0 %v97_v6 }
   0x2   :  { %41 = vmatpush.msra.mxu0 %v20_v0  ;;  %9 = vst [vmem:[#allocation2] sm:$0x1] %v8_v2  ;;  %v17_v4 = vld [vmem:[%s139_s1] sm:$0xff]  ;;  %v70_v27 = vand.u32 127, %v69_v25 }
   0x3   :  { %v16_v5 = vld [vmem:[%s141_s0] sm:$0xff] }
   0x4   :  { %42 = vmatpush.msra.mxu0 %v19_v1  ;;  %vm71_vm5 = vcmp.eq.s32.totalorder %v70_v27, 1 }
   0x6   :  { %43 = vmatpush.msra.mxu0 %v18_v3 }
   0x8   :  { %44 = vmatpush.msra.mxu0 %v17_v4 }
   0x9   :  { %89 = vmatmul.msk.f32.vlgmr.msra.gmra.mxu0 %vm25_vm0, %v16_v5  ;;  %v92_v7 = vld [vmem:[#allocation2] ss:$0 sm:$0xff] }
  0x86   :  { %v46_v8 = vpop.f32.mrf.mxu0 }
  0x87   :  { %v47_v9 = vadd.f32 %v92_v7, %v46_v8 }
  0x89   :  { %v49_v10 = vsub.f32 0.0, %v47_v9 }
  0x8b   :  { %v50_v11 = vmul.f32 1.442695, %v49_v10 }
  0x8d   :  { %93 = vpow2.f32 %v50_v11 }
  0x93   :  { %v94_v12 = vpop.eup %93 }
  0x94   :  { %v52_v13 = vadd.f32 1.0, %v94_v12 }
  0x96   :  { %95 = vrcp.f32 %v52_v13  ;;  %v64_v17 = vand.u32 2147483648, %v52_v13  ;;  %v62_v19 = vand.u32 2147483647, %v52_v13  ;;  %vm58_vm2 = vweird.f32 %v52_v13 }
  0x98   :  { %v65_v21 = vor.u32 1.1754944e-38, %v64_v17  ;;  %vm63_vm4 = vcmp.eq.f32.partialorder %v62_v19, 8.507059e+37 }
  0x9c   :  { %v96_v14 = vpop.eup %95 }
  0x9d   :  { %v54_v15 = vmul.f32 %v96_v14, %v52_v13  ;;  %vm59_vm1 = vweird.f32 %v96_v14 }
  0x9e   :  { %vm60_vm3 = vmor %vm58_vm2, %vm59_vm1 }
  0x9f   :  { %v55_v16 = vsub.f32 1.0, %v54_v15 }
  0xa1   :  { %v56_v18 = vmul.f32 %v96_v14, %v55_v16 }
  0xa3   :  { %v57_v20 = vadd.f32 %v96_v14, %v56_v18 }
  0xa5   :  { %v61_v22 = vsel %vm60_vm3, %v96_v14, %v57_v20 }
  0xa6   :  { %v66_v23 = vsel %vm63_vm4, %v65_v21, %v61_v22 }
  0xa7   :  { %74 = vperm.xlu0 %91, %v66_v23   ;;  %v68_v24 = vsub.f32 1.0, %v66_v23 }
  0xaf   :  { %79 = vperm.xlu0 %91, %v68_v24  }
 0x119   :  { %v75_v26 = vpop.permute.xlu0 %74 }
 0x121   :  { %v80_v28 = vpop.permute.xlu0 %79 }
 0x122   :  { %v82_v29 = vsel %vm71_vm5, %v75_v26, %v80_v28 }
 0x123   :  { %84 = vst.msk [vmem:[%s142_s3] sm:$0xff] %vm83_vm6, %v82_v29 }

</bundles_post_ra>
